<compile_context>
chip_gen: v7x
topology: tpu7x:2x2x1
jax: 0.10.0
libtpu: 0.0.40
codegen_flags: <defaults>
</compile_context>

<pallas_src>
import numpy as np
import jax
import jax.numpy as jnp
from jax.experimental import pallas as pl
from jax.experimental.pallas import tpu as pltpu


# -----------------------------------------------------------------------------
# Host-side bookkeeping: reproduce the per-dimension window layout of
# `inference_windows` and turn it into per-index "owner window" seam masks.
# -----------------------------------------------------------------------------
def _window_starts(sh, win, buf):
    """Exact port of the start-list construction in inference_windows (one dim)."""
    w, b = win, buf
    if w >= sh:
        w, b = sh, 0
    starts = [w, w - b]
    if starts[-1] >= sh or w >= sh:
        starts = [0]
    else:
        while starts[-1] < sh:
            starts.append(starts[-1] + w - b)
        starts = starts[:-1]
    starts[0] = 0
    return starts, w, b


def _seam_masks(sh, win, buf):
    """For each index along one spatial dim, the original stitching makes the final
    value come from exactly one window (the last writer).  Inside that window the
    network sees zero padding at the window edges.  Returns float {0,1} masks saying
    whether the i-1 / i+1 neighbours of index i lie inside i's owning window (and
    therefore inside the image)."""
    starts, w, b = _window_starts(sh, win, buf)
    owner = np.zeros(sh, dtype=np.int64)
    for beg in starts:                       # replay in loop order: last writer wins
        end = beg + w
        in_start = beg
        lo, hi = (0, w) if beg == 0 else (beg + b, end)
        if end > sh:                         # clamped final window
            in_start = sh - w
            lo, hi = sh - (w - b), sh
        owner[lo:hi] = in_start
    idx = np.arange(sh)
    prev_ok = ((idx - 1) >= owner).astype(np.float32)            # i-1 inside owner window
    next_ok = ((idx + 1) <= owner + w - 1).astype(np.float32)    # i+1 inside owner window
    return prev_ok, next_ok


# -----------------------------------------------------------------------------
# Generation-aware VMEM budgeting.
# -----------------------------------------------------------------------------
def _round_up(x, m):
    return ((x + m - 1) // m) * m


def _mask_bytes(H, W):
    # (2,H,1) + (2,1,W) f32 masks, double-buffered, padded to the (8,128) layout.
    return 2 * 4 * (2 * _round_up(H, 8) * 128 + 2 * 8 * _round_up(W, 128))


def _vmem_budget():
    """(per-step working-set budget, physical VMEM capacity) in bytes."""
    cap = 64 << 20                      # conservative fallback (v7x per-core VMEM)
    try:
        info = pltpu.get_tpu_info()
        cap = int(getattr(info, "vmem_capacity_bytes", cap) or cap)
    except Exception:
        pass
    budget = min(int(cap * 0.6), 96 << 20)   # v5e/v6e ~77 MiB, v7x ~38 MiB
    return budget, cap


def _choose_band_block(bands, H, W, itemsize, budget, max_unroll=64):
    """Largest band block whose working set fits `budget`, preferring >= 2 grid
    steps (pipelining) and an even grid (v7x two-TensorCore split), and capped so
    the static in-kernel band loop stays small."""
    slab_per_band = 4 * itemsize * H * W            # 2x input + 2x output pipeline buffers
    fixed = 24 * H * W + _mask_bytes(H, W)          # per-band (H,W) f32 temps + masks
    divisors = [d for d in range(1, bands + 1) if bands % d == 0 and d <= max_unroll]
    fitting = [d for d in divisors if fixed + d * slab_per_band <= budget] or [1]
    multi = [d for d in fitting if bands // d >= 2] or fitting
    best = max(multi)
    # Prefer an even grid length if it costs at most a 2x smaller slab.
    even = [d for d in multi if (bands // d) % 2 == 0 and 2 * d >= best]
    return max(even) if even else best


# -----------------------------------------------------------------------------
# Pallas kernel: masked 3x3 depthwise conv + bias + ReLU on a (Bb, H, W) slab.
# -----------------------------------------------------------------------------
def _make_masked_conv_kernel(weights, bias, band_block, H, W):
    w = [[float(weights[i, j]) for j in range(3)] for i in range(3)]
    b = float(bias)

    # pltpu.roll (XLU) only when the per-band tile is natively (8,128)-aligned;
    # otherwise slice+concat, which lowers cleanly for sub-tile widths (e.g. W=16).
    use_roll = (H % 8 == 0) and (W % 128 == 0) and H > 1 and W > 1

    def shift_cols(a, delta):            # value of a[:, c+delta] placed at column c
        if W == 1:
            return a
        if use_roll:
            return pltpu.roll(a, shift=(-delta) % W, axis=1)
        if delta == -1:
            return jnp.concatenate([a[:, :1], a[:, :W - 1]], axis=1)
        return jnp.concatenate([a[:, 1:], a[:, W - 1:]], axis=1)

    def shift_rows(a, delta):            # value of a[r+delta, :] placed at row r
        if H == 1:
            return a
        if use_roll:
            return pltpu.roll(a, shift=(-delta) % H, axis=0)
        if delta == -1:
            return jnp.concatenate([a[:1, :], a[:H - 1, :]], axis=0)
        return jnp.concatenate([a[1:, :], a[H - 1:, :]], axis=0)

    def kernel(x_ref, rmask_ref, cmask_ref, o_ref):
        # Tiny resident masks, hoisted once per grid step.
        tm = rmask_ref[0]                # (H, 1): row r-1 neighbour valid at row r
        bm = rmask_ref[1]                # (H, 1): row r+1 neighbour valid
        lm = cmask_ref[0]                # (1, W): col c-1 neighbour valid at col c
        rm = cmask_ref[1]                # (1, W): col c+1 neighbour valid

        # Static per-band loop: temporaries are only (H, W)-sized, so the slab
        # working set is just the pipeline buffers and band_block can be large.
        for bb in range(band_block):
            x = x_ref[bb].astype(jnp.float32)            # (H, W)
            xl = lm * shift_cols(x, -1)                  # x[r, c-1], seam/border-masked
            xr = rm * shift_cols(x, +1)                  # x[r, c+1]
            z0 = w[0][0] * xl + w[0][1] * x + w[0][2] * xr   # taps from row r-1
            z1 = w[1][0] * xl + w[1][1] * x + w[1][2] * xr   # taps from row r
            z2 = w[2][0] * xl + w[2][1] * x + w[2][2] * xr   # taps from row r+1
            acc = tm * shift_rows(z0, -1) + z1 + bm * shift_rows(z2, +1) + b
            o_ref[bb] = jnp.maximum(acc, 0.0).astype(o_ref.dtype)

    return kernel


# -----------------------------------------------------------------------------
# Fused windowed inference: one pallas_call replaces the whole window loop.
# -----------------------------------------------------------------------------
def fused_inference_windows(image, weights, bias, buff, window_size, band_window, frozen):
    orig_shape = image.shape
    H, W = image.shape[-2:]
    total_bands = int(np.prod(image.shape[:-2]))

    # Row / column seam masks from the original stitching.  Band windowing never
    # changes values for a per-band (depthwise) network — the band stitching
    # re-writes identical values — so no band mask is needed.
    top, bot = _seam_masks(H, window_size, buff[0])
    left, right = _seam_masks(W, window_size, buff[1])
    rmask = np.stack([top, bot]).astype(np.float32)[:, :, None]      # (2, H, 1)
    cmask = np.stack([left, right]).astype(np.float32)[:, None, :]   # (2, 1, W)

    itemsize = jnp.dtype(image.dtype).itemsize
    budget, cap = _vmem_budget()
    band_block = _choose_band_block(total_bands, H, W, itemsize, budget)
    grid = (total_bands // band_block,)

    # Explicit working-set estimate -> scoped-VMEM limit (with headroom for
    # Mosaic internal scratch), capped below physical capacity.
    ws = 4 * itemsize * band_block * H * W + 24 * H * W + _mask_bytes(H, W)
    vmem_limit = int(min(0.9 * cap, max(ws + (16 << 20), 32 << 20)))

    x3 = image.reshape(total_bands, H, W)
    kernel = _make_masked_conv_kernel(np.asarray(weights), float(bias), band_block, H, W)

    cost = pl.CostEstimate(
        flops=int(24 * total_bands * H * W),
        transcendentals=0,
        bytes_accessed=int(2 * itemsize * total_bands * H * W),
    )

    out = pl.pallas_call(
        kernel,
        out_shape=jax.ShapeDtypeStruct((total_bands, H, W), image.dtype),
        grid=grid,
        in_specs=[
            # Band-blocked image slab: last two block dims are full (H, W), so no
            # (8,128)/dtype min-tile divisibility constraints arise.
            pl.BlockSpec((band_block, H, W), lambda g: (g, 0, 0)),
            pl.BlockSpec((2, H, 1), lambda g: (0, 0, 0)),     # row seam masks (resident)
            pl.BlockSpec((2, 1, W), lambda g: (0, 0, 0)),     # col seam masks (resident)
        ],
        out_specs=pl.BlockSpec((band_block, H, W), lambda g: (g, 0, 0)),
        compiler_params=pltpu.CompilerParams(
            dimension_semantics=("parallel",),
            vmem_limit_bytes=vmem_limit,
        ),
        cost_estimate=cost,
    )(x3, jnp.asarray(rmask), jnp.asarray(cmask))

    out = out.reshape(orig_shape)
    if frozen:
        out = jax.lax.stop_gradient(out)     # analogue of torch.no_grad in _call_nn
    return out


# -----------------------------------------------------------------------------
# NNInference analogue (deterministic synthetic weights, no checkpoint load).
# -----------------------------------------------------------------------------
class NNInference:
    def __init__(self, frozen=True, band_window=10, window_shape=256):
        key = jax.random.PRNGKey(0)
        kw, kb = jax.random.split(key)
        self.weights = np.asarray(jax.random.normal(kw, (3, 3), jnp.float32)) * 0.1
        self.bias = float(jax.random.normal(kb, (), jnp.float32) * 0.1)
        self.frozen = frozen
        self.band_window = band_window
        self.window_shape = window_shape

    def forward(self, image, band_dim, normalize=False, permute=False):
        # TODO(synk): normalize / undo_normalize and the permute (HWC -> 5D) path
        # are not ported; this covers the NCHW, normalize=False, permute=False
        # windowed-inference path.
        assert not normalize and not permute
        assert self.window_shape is not None
        buff = (4, 4, 2)
        return fused_inference_windows(
            image, self.weights, self.bias, buff,
            self.window_shape, self.band_window, self.frozen)

    __call__ = forward


# -----------------------------------------------------------------------------
# Pure-JAX reference: faithful port of the original window loop (used only to
# verify that the fused kernel reproduces the original stitched semantics).
# -----------------------------------------------------------------------------
def _reference_network(weights, bias):
    def network(x):                                  # x: [1, bands, R, C]
        x4 = x[0]
        R, C = x4.shape[-2:]
        xp = jnp.pad(x4, ((0, 0), (1, 1), (1, 1)))
        acc = jnp.zeros_like(x4)
        for dr in range(3):
            for dc in range(3):
                acc = acc + float(weights[dr, dc]) * xp[:, dr:dr + R, dc:dc + C]
        return jnp.maximum(acc + float(bias), 0.0)[None]
    return network


def _reference_inference_windows(network, image, buff, window_size, band_window):
    band_dim, row_dim, col_dim = -3, -2, -1
    row_w, col_w = window_size, window_size
    sh_b, sh_r, sh_c = image.shape[-3:]
    buff = list(buff)
    if row_w >= sh_r:
        row_w = sh_r
        buff[0] = 0
    if col_w >= sh_c:
        col_w = sh_c
        buff[1] = 0

    def starts_for(sh, w, b):
        s = [w, w - b]
        if s[-1] >= sh or w >= sh:
            s = [0]
        else:
            while s[-1] < sh:
                s.append(s[-1] + w - b)
            s = s[:-1]
        s[0] = 0
        return s

    dim_r_starts = starts_for(sh_r, row_w, buff[0])
    dim_c_starts = starts_for(sh_c, col_w, buff[1])
    bw = band_window
    dim_b_starts = starts_for(sh_b, bw, buff[2])

    out = jnp.zeros_like(image)
    ndim = image.ndim
    for beg_r in dim_r_starts:
        sl = [slice(None)] * ndim
        end_r = beg_r + row_w
        sl[row_dim] = slice(beg_r, end_r)
        cut_slice = [slice(None)] * ndim
        cut_slice_out = [slice(None)] * ndim
        cut_slice_out[row_dim] = slice(0, row_w) if beg_r == 0 else slice(beg_r + buff[0], end_r)
        if beg_r != 0:
            cut_slice[row_dim] = slice(buff[0], None)
        if end_r > sh_r:
            sl[row_dim] = slice(sh_r - row_w, sh_r)
            cut_slice[row_dim] = slice(-1 * (row_w - buff[0]), None)
            cut_slice_out[row_dim] = slice(-1 * (row_w - buff[0]), None)
        cut_slice[col_dim] = slice(None)
        for beg_c in dim_c_starts:
            end_c = beg_c + col_w
            sl[col_dim] = slice(beg_c, end_c)
            cut_slice_out[col_dim] = slice(0, col_w) if beg_c == 0 else slice(beg_c + buff[1], end_c)
            if beg_c != 0:
                cut_slice[col_dim] = slice(buff[1], None)
            if end_c > sh_c:
                sl[col_dim] = slice(sh_c - col_w, sh_c)
                cut_slice[col_dim] = slice(-1 * (col_w - buff[1]), None)
                cut_slice_out[col_dim] = slice(-1 * (col_w - buff[1]), None)
            cut_slice[band_dim] = slice(None)
            for beg_b in dim_b_starts:
                end_b = beg_b + bw
                sl[band_dim] = slice(beg_b, end_b)
                cut_slice_out[band_dim] = slice(0, bw) if beg_b == 0 else slice(beg_b + buff[2], end_b)
                if beg_b != 0:
                    cut_slice[band_dim] = slice(buff[2], None)
                if end_b > sh_b:
                    sl[band_dim] = slice(sh_b - bw, sh_b)
                    cut_slice[band_dim] = slice(-1 * (bw - buff[2]), None)
                    cut_slice_out[band_dim] = slice(-1 * (bw - buff[2]), None)
                res = network(image[tuple(sl)])
                out = out.at[tuple(cut_slice_out)].set(res[tuple(cut_slice)])
    return out


if __name__ == "__main__":
    # Small shapes that still exercise overlapping-window stitching:
    # bands=6, H=W=16 with window_shape=8, band_window=4, buff=(4,4,2).
    key = jax.random.PRNGKey(0)
    image = jax.random.normal(key, (1, 6, 16, 16), jnp.float32)

    model = NNInference(frozen=True, band_window=4, window_shape=8)

    run = jax.jit(lambda img: model(img, band_dim=-3))
    out = jax.block_until_ready(run(image))

    assert out.shape == image.shape and out.dtype == image.dtype
    assert bool(jnp.all(jnp.isfinite(out)))

    # The fused single-call kernel must reproduce the original per-window,
    # zero-padded, overlap-stitched semantics exactly (up to fp reassociation).
    ref_net = _reference_network(model.weights, model.bias)
    ref = jax.jit(lambda img: _reference_inference_windows(
        ref_net, img, (4, 4, 2), model.window_shape, model.band_window))(image)
    ref = jax.block_until_ready(ref)
    assert bool(jnp.allclose(out, ref, atol=1e-5, rtol=1e-5))

    print("KERNEL_OK")
</pallas_src>

<mosaic_0001>
module attributes {stable_mosaic.version = 11 : i64} {
  func.func @kernel(%arg0: i32, %arg1: memref<3x16x16xf32, #tpu.memory_space<vmem>>, %arg2: memref<2x16x1xf32, #tpu.memory_space<vmem>>, %arg3: memref<2x1x16xf32, #tpu.memory_space<vmem>>, %arg4: memref<3x16x16xf32, #tpu.memory_space<vmem>>) attributes {dimension_semantics = [#tpu.dimension_semantics<parallel>], iteration_bounds = array<i64: 2>, scalar_prefetch = 0 : i64, scratch_operands = 0 : i64, tpu.core_type = #tpu.core_type<tc>, window_params = [{transform_indices = @transform_0, window_bounds = array<i64: 3, 16, 16>}, {pipeline_mode = #tpu.pipeline_mode<synchronous>, transform_indices = @transform_1, window_bounds = array<i64: 2, 16, 1>}, {pipeline_mode = #tpu.pipeline_mode<synchronous>, transform_indices = @transform_2, window_bounds = array<i64: 2, 1, 16>}, {transform_indices = @transform_3, window_bounds = array<i64: 3, 16, 16>}]} {
    %c0 = arith.constant 0 : index
    %c0_0 = arith.constant 0 : index
    %c0_1 = arith.constant 0 : index
    %0 = vector.load %arg2[%c0, %c0_0, %c0_1] : memref<2x16x1xf32, #tpu.memory_space<vmem>>, vector<1x16x1xf32>
    %1 = vector.shape_cast %0 : vector<1x16x1xf32> to vector<16x1xf32>
    %c1 = arith.constant 1 : index
    %c0_2 = arith.constant 0 : index
    %c0_3 = arith.constant 0 : index
    %2 = vector.load %arg2[%c1, %c0_2, %c0_3] : memref<2x16x1xf32, #tpu.memory_space<vmem>>, vector<1x16x1xf32>
    %3 = vector.shape_cast %2 : vector<1x16x1xf32> to vector<16x1xf32>
    %c0_4 = arith.constant 0 : index
    %c0_5 = arith.constant 0 : index
    %c0_6 = arith.constant 0 : index
    %4 = vector.load %arg3[%c0_4, %c0_5, %c0_6] : memref<2x1x16xf32, #tpu.memory_space<vmem>>, vector<1x1x16xf32>
    %5 = vector.shape_cast %4 : vector<1x1x16xf32> to vector<1x16xf32>
    %c1_7 = arith.constant 1 : index
    %c0_8 = arith.constant 0 : index
    %c0_9 = arith.constant 0 : index
    %6 = vector.load %arg3[%c1_7, %c0_8, %c0_9] : memref<2x1x16xf32, #tpu.memory_space<vmem>>, vector<1x1x16xf32>
    %7 = vector.shape_cast %6 : vector<1x1x16xf32> to vector<1x16xf32>
    %c0_10 = arith.constant 0 : index
    %c0_11 = arith.constant 0 : index
    %c0_12 = arith.constant 0 : index
    %8 = vector.load %arg1[%c0_10, %c0_11, %c0_12] : memref<3x16x16xf32, #tpu.memory_space<vmem>>, vector<1x16x16xf32>
    %9 = vector.shape_cast %8 : vector<1x16x16xf32> to vector<16x16xf32>
    %10 = vector.extract_strided_slice %9 {offsets = [0, 0], sizes = [16, 1], strides = [1, 1]} : vector<16x16xf32> to vector<16x1xf32>
    %11 = vector.extract_strided_slice %9 {offsets = [0, 0], sizes = [16, 15], strides = [1, 1]} : vector<16x16xf32> to vector<16x15xf32>
    %12 = tpu.concatenate %10, %11 in 1 : vector<16x1xf32>, vector<16x15xf32> -> vector<16x16xf32>
    %13 = vector.broadcast %5 : vector<1x16xf32> to vector<16x16xf32>
    %14 = arith.mulf %13, %12 : vector<16x16xf32>
    %15 = vector.extract_strided_slice %9 {offsets = [0, 1], sizes = [16, 15], strides = [1, 1]} : vector<16x16xf32> to vector<16x15xf32>
    %16 = vector.extract_strided_slice %9 {offsets = [0, 15], sizes = [16, 1], strides = [1, 1]} : vector<16x16xf32> to vector<16x1xf32>
    %17 = tpu.concatenate %15, %16 in 1 : vector<16x15xf32>, vector<16x1xf32> -> vector<16x16xf32>
    %18 = vector.broadcast %7 : vector<1x16xf32> to vector<16x16xf32>
    %19 = arith.mulf %18, %17 : vector<16x16xf32>
    %cst = arith.constant 0.100401424 : f32
    %20 = vector.broadcast %cst : f32 to vector<16x16xf32>
    %21 = arith.mulf %20, %14 : vector<16x16xf32>
    %cst_13 = arith.constant -0.0906337201 : f32
    %22 = vector.broadcast %cst_13 : f32 to vector<16x16xf32>
    %23 = arith.mulf %22, %9 : vector<16x16xf32>
    %24 = arith.addf %21, %23 : vector<16x16xf32>
    %cst_14 = arith.constant -0.0748172253 : f32
    %25 = vector.broadcast %cst_14 : f32 to vector<16x16xf32>
    %26 = arith.mulf %25, %19 : vector<16x16xf32>
    %27 = arith.addf %24, %26 : vector<16x16xf32>
    %cst_15 = arith.constant -0.117136694 : f32
    %28 = vector.broadcast %cst_15 : f32 to vector<16x16xf32>
    %29 = arith.mulf %28, %14 : vector<16x16xf32>
    %cst_16 = arith.constant -0.0871232822 : f32
    %30 = vector.broadcast %cst_16 : f32 to vector<16x16xf32>
    %31 = arith.mulf %30, %9 : vector<16x16xf32>
    %32 = arith.addf %29, %31 : vector<16x16xf32>
    %cst_17 = arith.constant 0.0588838123 : f32
    %33 = vector.broadcast %cst_17 : f32 to vector<16x16xf32>
    %34 = arith.mulf %33, %19 : vector<16x16xf32>
    %35 = arith.addf %32, %34 : vector<16x16xf32>
    %cst_18 = arith.constant 0.0723929927 : f32
    %36 = vector.broadcast %cst_18 : f32 to vector<16x16xf32>
    %37 = arith.mulf %36, %14 : vector<16x16xf32>
    %cst_19 = arith.constant -0.10255982 : f32
    %38 = vector.broadcast %cst_19 : f32 to vector<16x16xf32>
    %39 = arith.mulf %38, %9 : vector<16x16xf32>
    %40 = arith.addf %37, %39 : vector<16x16xf32>
    %cst_20 = arith.constant 0.166162804 : f32
    %41 = vector.broadcast %cst_20 : f32 to vector<16x16xf32>
    %42 = arith.mulf %41, %19 : vector<16x16xf32>
    %43 = arith.addf %40, %42 : vector<16x16xf32>
    %44 = vector.extract_strided_slice %27 {offsets = [0, 0], sizes = [1, 16], strides = [1, 1]} : vector<16x16xf32> to vector<1x16xf32>
    %45 = vector.extract_strided_slice %27 {offsets = [0, 0], sizes = [15, 16], strides = [1, 1]} : vector<16x16xf32> to vector<15x16xf32>
    %46 = tpu.concatenate %44, %45 in 0 : vector<1x16xf32>, vector<15x16xf32> -> vector<16x16xf32>
    %47 = vector.broadcast %1 : vector<16x1xf32> to vector<16x16xf32>
    %48 = arith.mulf %47, %46 : vector<16x16xf32>
    %49 = arith.addf %48, %35 : vector<16x16xf32>
    %50 = vector.extract_strided_slice %43 {offsets = [1, 0], sizes = [15, 16], strides = [1, 1]} : vector<16x16xf32> to vector<15x16xf32>
    %51 = vector.extract_strided_slice %43 {offsets = [15, 0], sizes = [1, 16], strides = [1, 1]} : vector<16x16xf32> to vector<1x16xf32>
    %52 = tpu.concatenate %50, %51 in 0 : vector<15x16xf32>, vector<1x16xf32> -> vector<16x16xf32>
    %53 = vector.broadcast %3 : vector<16x1xf32> to vector<16x16xf32>
    %54 = arith.mulf %53, %52 : vector<16x16xf32>
    %55 = arith.addf %49, %54 : vector<16x16xf32>
    %cst_21 = arith.constant -0.244245574 : f32
    %56 = vector.broadcast %cst_21 : f32 to vector<16x16xf32>
    %57 = arith.addf %55, %56 : vector<16x16xf32>
    %cst_22 = arith.constant 0.000000e+00 : f32
    %58 = vector.broadcast %cst_22 : f32 to vector<16x16xf32>
    %59 = arith.maximumf %57, %58 : vector<16x16xf32>
    %c0_23 = arith.constant 0 : index
    %c0_24 = arith.constant 0 : index
    %c0_25 = arith.constant 0 : index
    %60 = vector.load %arg4[%c0_23, %c0_24, %c0_25] : memref<3x16x16xf32, #tpu.memory_space<vmem>>, vector<1x16x16xf32>
    %61 = vector.shape_cast %60 : vector<1x16x16xf32> to vector<16x16xf32>
    %62 = vector.shape_cast %59 : vector<16x16xf32> to vector<1x16x16xf32>
    tpu.vector_store %arg4[%c0_23, %c0_24, %c0_25], %62 {strides = array<i32>} : memref<3x16x16xf32, #tpu.memory_space<vmem>>, vector<1x16x16xf32>,
    %c1_26 = arith.constant 1 : index
    %c0_27 = arith.constant 0 : index
    %c0_28 = arith.constant 0 : index
    %63 = vector.load %arg1[%c1_26, %c0_27, %c0_28] : memref<3x16x16xf32, #tpu.memory_space<vmem>>, vector<1x16x16xf32>
    %64 = vector.shape_cast %63 : vector<1x16x16xf32> to vector<16x16xf32>
    %65 = vector.extract_strided_slice %64 {offsets = [0, 0], sizes = [16, 1], strides = [1, 1]} : vector<16x16xf32> to vector<16x1xf32>
    %66 = vector.extract_strided_slice %64 {offsets = [0, 0], sizes = [16, 15], strides = [1, 1]} : vector<16x16xf32> to vector<16x15xf32>
    %67 = tpu.concatenate %65, %66 in 1 : vector<16x1xf32>, vector<16x15xf32> -> vector<16x16xf32>
    %68 = vector.broadcast %5 : vector<1x16xf32> to vector<16x16xf32>
    %69 = arith.mulf %68, %67 : vector<16x16xf32>
    %70 = vector.extract_strided_slice %64 {offsets = [0, 1], sizes = [16, 15], strides = [1, 1]} : vector<16x16xf32> to vector<16x15xf32>
    %71 = vector.extract_strided_slice %64 {offsets = [0, 15], sizes = [16, 1], strides = [1, 1]} : vector<16x16xf32> to vector<16x1xf32>
    %72 = tpu.concatenate %70, %71 in 1 : vector<16x15xf32>, vector<16x1xf32> -> vector<16x16xf32>
    %73 = vector.broadcast %7 : vector<1x16xf32> to vector<16x16xf32>
    %74 = arith.mulf %73, %72 : vector<16x16xf32>
    %cst_29 = arith.constant 0.100401424 : f32
    %75 = vector.broadcast %cst_29 : f32 to vector<16x16xf32>
    %76 = arith.mulf %75, %69 : vector<16x16xf32>
    %cst_30 = arith.constant -0.0906337201 : f32
    %77 = vector.broadcast %cst_30 : f32 to vector<16x16xf32>
    %78 = arith.mulf %77, %64 : vector<16x16xf32>
    %79 = arith.addf %76, %78 : vector<16x16xf32>
    %cst_31 = arith.constant -0.0748172253 : f32
    %80 = vector.broadcast %cst_31 : f32 to vector<16x16xf32>
    %81 = arith.mulf %80, %74 : vector<16x16xf32>
    %82 = arith.addf %79, %81 : vector<16x16xf32>
    %cst_32 = arith.constant -0.117136694 : f32
    %83 = vector.broadcast %cst_32 : f32 to vector<16x16xf32>
    %84 = arith.mulf %83, %69 : vector<16x16xf32>
    %cst_33 = arith.constant -0.0871232822 : f32
    %85 = vector.broadcast %cst_33 : f32 to vector<16x16xf32>
    %86 = arith.mulf %85, %64 : vector<16x16xf32>
    %87 = arith.addf %84, %86 : vector<16x16xf32>
    %cst_34 = arith.constant 0.0588838123 : f32
    %88 = vector.broadcast %cst_34 : f32 to vector<16x16xf32>
    %89 = arith.mulf %88, %74 : vector<16x16xf32>
    %90 = arith.addf %87, %89 : vector<16x16xf32>
    %cst_35 = arith.constant 0.0723929927 : f32
    %91 = vector.broadcast %cst_35 : f32 to vector<16x16xf32>
    %92 = arith.mulf %91, %69 : vector<16x16xf32>
    %cst_36 = arith.constant -0.10255982 : f32
    %93 = vector.broadcast %cst_36 : f32 to vector<16x16xf32>
    %94 = arith.mulf %93, %64 : vector<16x16xf32>
    %95 = arith.addf %92, %94 : vector<16x16xf32>
    %cst_37 = arith.constant 0.166162804 : f32
    %96 = vector.broadcast %cst_37 : f32 to vector<16x16xf32>
    %97 = arith.mulf %96, %74 : vector<16x16xf32>
    %98 = arith.addf %95, %97 : vector<16x16xf32>
    %99 = vector.extract_strided_slice %82 {offsets = [0, 0], sizes = [1, 16], strides = [1, 1]} : vector<16x16xf32> to vector<1x16xf32>
    %100 = vector.extract_strided_slice %82 {offsets = [0, 0], sizes = [15, 16], strides = [1, 1]} : vector<16x16xf32> to vector<15x16xf32>
    %101 = tpu.concatenate %99, %100 in 0 : vector<1x16xf32>, vector<15x16xf32> -> vector<16x16xf32>
    %102 = vector.broadcast %1 : vector<16x1xf32> to vector<16x16xf32>
    %103 = arith.mulf %102, %101 : vector<16x16xf32>
    %104 = arith.addf %103, %90 : vector<16x16xf32>
    %105 = vector.extract_strided_slice %98 {offsets = [1, 0], sizes = [15, 16], strides = [1, 1]} : vector<16x16xf32> to vector<15x16xf32>
    %106 = vector.extract_strided_slice %98 {offsets = [15, 0], sizes = [1, 16], strides = [1, 1]} : vector<16x16xf32> to vector<1x16xf32>
    %107 = tpu.concatenate %105, %106 in 0 : vector<15x16xf32>, vector<1x16xf32> -> vector<16x16xf32>
    %108 = vector.broadcast %3 : vector<16x1xf32> to vector<16x16xf32>
    %109 = arith.mulf %108, %107 : vector<16x16xf32>
    %110 = arith.addf %104, %109 : vector<16x16xf32>
    %cst_38 = arith.constant -0.244245574 : f32
    %111 = vector.broadcast %cst_38 : f32 to vector<16x16xf32>
    %112 = arith.addf %110, %111 : vector<16x16xf32>
    %cst_39 = arith.constant 0.000000e+00 : f32
    %113 = vector.broadcast %cst_39 : f32 to vector<16x16xf32>
    %114 = arith.maximumf %112, %113 : vector<16x16xf32>
    %c1_40 = arith.constant 1 : index
    %c0_41 = arith.constant 0 : index
    %c0_42 = arith.constant 0 : index
    %115 = vector.load %arg4[%c1_40, %c0_41, %c0_42] : memref<3x16x16xf32, #tpu.memory_space<vmem>>, vector<1x16x16xf32>
    %116 = vector.shape_cast %115 : vector<1x16x16xf32> to vector<16x16xf32>
    %117 = vector.shape_cast %114 : vector<16x16xf32> to vector<1x16x16xf32>
    tpu.vector_store %arg4[%c1_40, %c0_41, %c0_42], %117 {strides = array<i32>} : memref<3x16x16xf32, #tpu.memory_space<vmem>>, vector<1x16x16xf32>,
    %c2 = arith.constant 2 : index
    %c0_43 = arith.constant 0 : index
    %c0_44 = arith.constant 0 : index
    %118 = vector.load %arg1[%c2, %c0_43, %c0_44] : memref<3x16x16xf32, #tpu.memory_space<vmem>>, vector<1x16x16xf32>
    %119 = vector.shape_cast %118 : vector<1x16x16xf32> to vector<16x16xf32>
    %120 = vector.extract_strided_slice %119 {offsets = [0, 0], sizes = [16, 1], strides = [1, 1]} : vector<16x16xf32> to vector<16x1xf32>
    %121 = vector.extract_strided_slice %119 {offsets = [0, 0], sizes = [16, 15], strides = [1, 1]} : vector<16x16xf32> to vector<16x15xf32>
    %122 = tpu.concatenate %120, %121 in 1 : vector<16x1xf32>, vector<16x15xf32> -> vector<16x16xf32>
    %123 = vector.broadcast %5 : vector<1x16xf32> to vector<16x16xf32>
    %124 = arith.mulf %123, %122 : vector<16x16xf32>
    %125 = vector.extract_strided_slice %119 {offsets = [0, 1], sizes = [16, 15], strides = [1, 1]} : vector<16x16xf32> to vector<16x15xf32>
    %126 = vector.extract_strided_slice %119 {offsets = [0, 15], sizes = [16, 1], strides = [1, 1]} : vector<16x16xf32> to vector<16x1xf32>
    %127 = tpu.concatenate %125, %126 in 1 : vector<16x15xf32>, vector<16x1xf32> -> vector<16x16xf32>
    %128 = vector.broadcast %7 : vector<1x16xf32> to vector<16x16xf32>
    %129 = arith.mulf %128, %127 : vector<16x16xf32>
    %cst_45 = arith.constant 0.100401424 : f32
    %130 = vector.broadcast %cst_45 : f32 to vector<16x16xf32>
    %131 = arith.mulf %130, %124 : vector<16x16xf32>
    %cst_46 = arith.constant -0.0906337201 : f32
    %132 = vector.broadcast %cst_46 : f32 to vector<16x16xf32>
    %133 = arith.mulf %132, %119 : vector<16x16xf32>
    %134 = arith.addf %131, %133 : vector<16x16xf32>
    %cst_47 = arith.constant -0.0748172253 : f32
    %135 = vector.broadcast %cst_47 : f32 to vector<16x16xf32>
    %136 = arith.mulf %135, %129 : vector<16x16xf32>
    %137 = arith.addf %134, %136 : vector<16x16xf32>
    %cst_48 = arith.constant -0.117136694 : f32
    %138 = vector.broadcast %cst_48 : f32 to vector<16x16xf32>
    %139 = arith.mulf %138, %124 : vector<16x16xf32>
    %cst_49 = arith.constant -0.0871232822 : f32
    %140 = vector.broadcast %cst_49 : f32 to vector<16x16xf32>
    %141 = arith.mulf %140, %119 : vector<16x16xf32>
    %142 = arith.addf %139, %141 : vector<16x16xf32>
    %cst_50 = arith.constant 0.0588838123 : f32
    %143 = vector.broadcast %cst_50 : f32 to vector<16x16xf32>
    %144 = arith.mulf %143, %129 : vector<16x16xf32>
    %145 = arith.addf %142, %144 : vector<16x16xf32>
    %cst_51 = arith.constant 0.0723929927 : f32
    %146 = vector.broadcast %cst_51 : f32 to vector<16x16xf32>
    %147 = arith.mulf %146, %124 : vector<16x16xf32>
    %cst_52 = arith.constant -0.10255982 : f32
    %148 = vector.broadcast %cst_52 : f32 to vector<16x16xf32>
    %149 = arith.mulf %148, %119 : vector<16x16xf32>
    %150 = arith.addf %147, %149 : vector<16x16xf32>
    %cst_53 = arith.constant 0.166162804 : f32
    %151 = vector.broadcast %cst_53 : f32 to vector<16x16xf32>
    %152 = arith.mulf %151, %129 : vector<16x16xf32>
    %153 = arith.addf %150, %152 : vector<16x16xf32>
    %154 = vector.extract_strided_slice %137 {offsets = [0, 0], sizes = [1, 16], strides = [1, 1]} : vector<16x16xf32> to vector<1x16xf32>
    %155 = vector.extract_strided_slice %137 {offsets = [0, 0], sizes = [15, 16], strides = [1, 1]} : vector<16x16xf32> to vector<15x16xf32>
    %156 = tpu.concatenate %154, %155 in 0 : vector<1x16xf32>, vector<15x16xf32> -> vector<16x16xf32>
    %157 = vector.broadcast %1 : vector<16x1xf32> to vector<16x16xf32>
    %158 = arith.mulf %157, %156 : vector<16x16xf32>
    %159 = arith.addf %158, %145 : vector<16x16xf32>
    %160 = vector.extract_strided_slice %153 {offsets = [1, 0], sizes = [15, 16], strides = [1, 1]} : vector<16x16xf32> to vector<15x16xf32>
    %161 = vector.extract_strided_slice %153 {offsets = [15, 0], sizes = [1, 16], strides = [1, 1]} : vector<16x16xf32> to vector<1x16xf32>
    %162 = tpu.concatenate %160, %161 in 0 : vector<15x16xf32>, vector<1x16xf32> -> vector<16x16xf32>
    %163 = vector.broadcast %3 : vector<16x1xf32> to vector<16x16xf32>
    %164 = arith.mulf %163, %162 : vector<16x16xf32>
    %165 = arith.addf %159, %164 : vector<16x16xf32>
    %cst_54 = arith.constant -0.244245574 : f32
    %166 = vector.broadcast %cst_54 : f32 to vector<16x16xf32>
    %167 = arith.addf %165, %166 : vector<16x16xf32>
    %cst_55 = arith.constant 0.000000e+00 : f32
    %168 = vector.broadcast %cst_55 : f32 to vector<16x16xf32>
    %169 = arith.maximumf %167, %168 : vector<16x16xf32>
    %c2_56 = arith.constant 2 : index
    %c0_57 = arith.constant 0 : index
    %c0_58 = arith.constant 0 : index
    %170 = vector.load %arg4[%c2_56, %c0_57, %c0_58] : memref<3x16x16xf32, #tpu.memory_space<vmem>>, vector<1x16x16xf32>
    %171 = vector.shape_cast %170 : vector<1x16x16xf32> to vector<16x16xf32>
    %172 = vector.shape_cast %169 : vector<16x16xf32> to vector<1x16x16xf32>
    tpu.vector_store %arg4[%c2_56, %c0_57, %c0_58], %172 {strides = array<i32>} : memref<3x16x16xf32, #tpu.memory_space<vmem>>, vector<1x16x16xf32>,
    return
  }
  func.func @transform_0(%arg0: i32) -> (i32, i32, i32) {
    %c0_i32 = arith.constant 0 : i32
    %c0_i32_0 = arith.constant 0 : i32
    %c0_i32_1 = arith.constant 0 : i32
    return %arg0, %c0_i32, %c0_i32_0 : i32, i32, i32
  }
  func.func @transform_1(%arg0: i32) -> (i32, i32, i32) {
    %c0_i32 = arith.constant 0 : i32
    %c0_i32_0 = arith.constant 0 : i32
    %c0_i32_1 = arith.constant 0 : i32
    %c0_i32_2 = arith.constant 0 : i32
    return %c0_i32, %c0_i32_0, %c0_i32_1 : i32, i32, i32
  }
  func.func @transform_2(%arg0: i32) -> (i32, i32, i32) {
    %c0_i32 = arith.constant 0 : i32
    %c0_i32_0 = arith.constant 0 : i32
    %c0_i32_1 = arith.constant 0 : i32
    %c0_i32_2 = arith.constant 0 : i32
    return %c0_i32, %c0_i32_0, %c0_i32_1 : i32, i32, i32
  }
  func.func @transform_3(%arg0: i32) -> (i32, i32, i32) {
    %c0_i32 = arith.constant 0 : i32
    %c0_i32_0 = arith.constant 0 : i32
    %c0_i32_1 = arith.constant 0 : i32
    return %arg0, %c0_i32, %c0_i32_0 : i32, i32, i32
  }
}

</mosaic_0001>

<bundles_post_ra>
// kernel: _lambda_.1
= control target key start
LH: loop header
LB: loop body
LE: loop exit
PB: predicated region body
PF: predicated region fallthrough
CT: control target
= control target key end

     0   :  { %8 = vsyncpa [#allocation3], 0  ;;  %s1179_s0 = inlined_call_operand.hbm [shape: f32[6,16,16], index: 0, kind: input, shape index: {}]   ;;  %s1180_s1 = inlined_call_operand.hbm [shape: f32[2,16,1], index: 1, kind: input, shape index: {}]   ;;  %s1181_s2 = inlined_call_operand.vmem [shape: f32[2,1,16], index: 2, kind: input, shape index: {}]   ;;  %s1182_s3 = inlined_call_operand.hbm [shape: f32[6,16,16], index: 3, kind: output, shape index: {}]  }
   0x1   :  { %10 = vsyncpa [#allocation3 + $0x1], 0 }
   0x2   :  { %11 = vsyncpa [#allocation6], 0 }
   0x3   :  { %12 = vsyncpa [#allocation4], 0 }
   0x4   :  { %14 = vsyncpa [#allocation4 + $0x1], 0  ;;  %s863_s12 = smov 0   ;;  %s865_s13 = smov 0  }
   0x5   :  { %s867_s14 = smov 0   ;;  %s869_s15 = smov 0  }
   0x6 LB: > { %s884_s16 = sadd.s32 4294967295, %s831_s15   ;;  %s606_s17 = sadd.s32 4294967294, %s831_s15   ;;  %s831_s15 = sphi %s869_s15, %s1202_s15   ;;  %s827_s14 = sphi %s867_s14, %s1201_s14   ;;  %s823_s13 = sphi %s865_s13, %s1200_s13   ;;  %s819_s12 = sphi %s863_s12, %s1199_s12  }
   0x7   : > { %p40_p0 = scmp.ne.s32.totalorder %s823_s13, %s819_s12  ;;  %p1183_p1 = scmp.eq.s32.totalorder %s884_s16, 0 }
   0x8   : > { %p112_p3 = scmp.eq.s32.totalorder %s606_s17, 1  ;;  %p607_p5 = scmp.ge.s32.totalorder %s831_s15, 1 }
   0x9   : > { %p893_p4 = por %p1183_p1, %p40_p0  ;;  %p119_p7 = scmp.lt.s32.totalorder %s831_s15, 3 }
   0xa   : > { %p898_p6 = por %p112_p3, %p40_p0  ;;  %s833_s21 = smov [#allocation5]  }
   0xb   : > { %s1186_s18 = scalar_select %p893_p4, 1, 0 }
   0xc   : > { %s1187_s19 = scalar_select %p898_p6, 1, 0 }
   0xd   : > { %p903_p8 = pnand %p607_p5, %p119_p7  ;;  %s131_s22 = sshll.u32 %s833_s21, 4  ;;  %s907_s22 = int_to_ptr.vmem [resolvable:$true] %s131_s22 }
   0xe   : > { %s919_s24 = sadd.s32 1, %s831_s15   ;;  %s27_s25 = sadd.s32 1, %s827_s14 }
   0xf   : > { %s1188_s20 = scalar_select %p903_p8, 1, 0 }
  0x10   : > { %p645_p9 = pneg %p903_p8  ;;  %s24_s26 = ssub.s32 %s831_s15, %s919_s24 }
  0x11   : > { %s703_s29 = scalar_lea.hbm %s1180_s1, 512 }
  0x12   : > { %p914_p11 = pnand %p645_p9, %p1183_p1  ;;  %p704_p12 = scmp.ne.s32.totalorder %s1180_s1, %s703_s29 }
  0x13   : > { %p710_p5 = scmp.lt.u32.totalorder %s703_s29, %s1180_s1 }
  0x14   : > { %p705_p13 = pneg %p914_p11 }
  0x16   : > { %p706_p0 = pnand %p705_p13, %p704_p12 }
  0x18   : > { %p707_p3 = pneg %p706_p0 }
  0x1a   : > { %p712_p7 = pnand %p710_p5, %p707_p3 }
  0x1c   : > { %715 = shalt.err (!%p712_p7)
}
  0x1d   : > { %s716_s7 = scalar_lea.vmem %s907_s22, 512  ;;  %p724_p2 = scmp.lt.s32.totalorder %s907_s22, %s907_s22 }
  0x1e   : > { %p717_p9 = scmp.ne.s32.totalorder %s907_s22, %s716_s7  ;;  %p725_p6 = scmp.lt.s32.totalorder %s716_s7, %s716_s7 }
  0x20   : > { %p719_p10 = pnand %p717_p9, %p705_p13  ;;  %p726_p4 = por %p725_p6, %p724_p2 }
  0x22   : > { %p720_p1 = pneg %p719_p10 }
  0x24   : > { %p727_p8 = pnand %p726_p4, %p720_p1 }
  0x26   : > { %730 = shalt.err (!%p727_p8)
}
  0x27   : > { %s834_s8 = smov 128   ;;  %s835_s9 = smov 8  }
  0x28   : > { %648 = dma.hbm_to_vmem [thread:$0]  (!%p914_p11), %s1180_s1, 512, %s907_s22, [#allocation6], %s834_s8, %s834_s8, %s835_s9  }
  0x29   : > { %p25_p1 = scmp.eq.s32.totalorder %s24_s26, 0  ;;  %p34_p2 = scmp.ne.s32.totalorder %s827_s14, %s823_s13 }
  0x2a   : > { %p35_p4 = scmp.eq.s32.totalorder %s831_s15, 0  ;;  %p658_p6 = scmp.lt.s32.totalorder %s831_s15, 2 }
  0x2b   : > { %s953_s17 = scalar_select %p25_p1, %s827_s14, %s27_s25  }
  0x2c   : > { %p36_p8 = por %p35_p4, %p34_p2  ;;  %p1190_p10 = scmp.eq.s32.totalorder %s884_s16, 1 }
  0x2d   : > { %s148_s23 = sand.u32 1, %s827_s14   ;;  %s633_s27 = smul.u32 768, %s831_s15 }
  0x2e   : > { %p957_p12 = por %p1190_p10, %p34_p2  ;;  %s635_s28 = smul.u32 48, %s148_s23 }
  0x2f   : > { %p963_p13 = pnand %p658_p6, %p36_p8  ;;  %s970_s25 = scalar_lea.hbm %s1179_s0, %s633_s27 }
  0x30   : > { %s152_s30 = scalar_lea.vmem [#allocation2], %s635_s28  ;;  %s974_s5 = scalar_lea.sflag [#allocation3], %s148_s23 }
  0x31   : > { %s160_s4 = sshll.u32 %s152_s30, 4  ;;  %s731_s6 = scalar_lea.hbm %s970_s25, 768  ;;  %s972_s4 = int_to_ptr.vmem [resolvable:$true] %s160_s4 }
  0x32   : > { %p732_p11 = scmp.ne.s32.totalorder %s970_s25, %s731_s6  ;;  %p733_p0 = pneg %p963_p13 }
  0x33   : > { %s736_s11 = scalar_lea.hbm %s1179_s0, 1536  ;;  %p737_p7 = scmp.lt.u32.totalorder %s970_s25, %s1179_s0 }
  0x34   : > { %p734_p3 = pnand %p733_p0, %p732_p11  ;;  %p738_p9 = scmp.lt.u32.totalorder %s736_s11, %s731_s6 }
  0x35   : > { %p740_p2 = scmp.lt.u32.totalorder %s731_s6, %s970_s25 }
  0x36   : > { %p735_p5 = pneg %p734_p3  ;;  %p739_p1 = por %p738_p9, %p737_p7 }
  0x38   : > { %p741_p4 = por %p740_p2, %p739_p1 }
  0x3a   : > { %p742_p6 = pnand %p741_p4, %p735_p5 }
  0x3c   : > { %745 = shalt.err (!%p742_p6)
}
  0x3d   : > { %s746_s23 = scalar_lea.vmem %s972_s4, 768  ;;  %s836_s28 = smov [#allocation2]  }
  0x3e   : > { %p747_p8 = scmp.ne.s32.totalorder %s972_s4, %s746_s23  ;;  %s751_s26 = sshll.u32 %s836_s28, 4  ;;  %s752_s26 = int_to_ptr.vmem [resolvable:$false] %s751_s26 }
  0x3f   : > { %s753_s30 = scalar_lea.vmem %s752_s26, 1536  ;;  %p754_p3 = scmp.lt.s32.totalorder %s972_s4, %s752_s26 }
  0x40   : > { %p749_p10 = pnand %p747_p8, %p733_p0  ;;  %p755_p7 = scmp.lt.s32.totalorder %s753_s30, %s746_s23 }
  0x42   : > { %p750_p11 = pneg %p749_p10  ;;  %p756_p9 = por %p755_p7, %p754_p3 }
  0x44   : > { %p757_p1 = pnand %p756_p9, %p750_p11 }
  0x46   : > { %760 = shalt.err (!%p757_p1)
}
  0x47   : > { %652 = dma.hbm_to_vmem [thread:$0]  (!%p963_p13), %s970_s25, 768, %s972_s4, %s974_s5, %s834_s8, %s834_s8, %s835_s9  }
  0x48   : > { %p1193_p0 = scmp.ne.s32.totalorder %s1188_s20, 0 }
  0x49   : > { %s1008_s6 = sand.u32 (!%p1193_p0), 1, %s823_s13   ;;  %p1194_p5 = scmp.ne.s32.totalorder (!%p1193_p0), %s1186_s18, 0 }
  0x4a   : > { %172 = sbr.rel (%p1193_p0) target bundleno = 268 (0x10c), region = 32  ;;  %s175_s10 = scalar_lea.sflag (!%p1193_p0), [#allocation3], %s1008_s6 }
  0x4b   : > { %s636_s7 = smul.u32 (!%p1193_p0), 48, %s1008_s6 }
  0x4d   : > { %s178_s29 = scalar_lea.vmem (!%p1193_p0), [#allocation2], %s636_s7 }
  0x51   : > { %806 = dma.done.wait (%p1194_p5), %s175_s10, 768  }
  0x52   : > { %808 = vsyncadd (%p1194_p5), %s175_s10, 4294966528  ;;  %p1195_p13 = scmp.eq.s32.totalorder %s884_s16, 0 }
  0x54   : > { %810 = dma.done.wait (%p1195_p13), [#allocation6], 512   ;;  %p1196_p2 = pmov %p1195_p13 }
  0x55   : > { %v837_v0 = vmov 0   ;;  %v1022_v1 = vld [vmem:[%s178_s29 + $0x10] sm:$0xff]  ;;  %v1024_v2 = vld [vmem:[%s178_s29] sm:$0xff]  ;;  %s838_s20 = smov 1   ;;  %v1028_v3 = vld [vmem:[%s178_s29 + $0x18] sm:$0xff]  ;;  %s839_s18 = smov 127  }
  0x56   : > { %812 = vsyncadd (%p1196_p2), [#allocation6], 4294966784  ;;  %702 = vset.pattern.permute.xlu1 %v837_v0  ;;  %701 = vset.pattern.permute.xlu0 %v837_v0  ;;  %v1030_v4 = vld [vmem:[%s178_s29 + $0x8] sm:$0xff]  ;;  %v1036_v6 = vld [vmem:[%s178_s29 + $0x20] sm:$0xff]  ;;  %vm225_vm0 = vcmask 7168   ;;  %vm242_vm1 = vcmask 121856  }
  0x57   : > { %341 = vrot.lane.b32.xlu1 %v1022_v1, %s838_s20  ;;  %219 = vrot.lane.b32.xlu0 %v1024_v2, %s838_s20  ;;  %v1034_v5 = vld [vmem:[%s178_s29 + $0x28] sm:$0xff]  ;;  %v207_v8 = vld [vmem:[#allocation5] sm:$0xff]  ;;  %v210_v9 = vld [vmem:[#allocation5 + $0x10] sm:$0xff]  ;;  %v363_v16 = vmul.f32 -0.09063372, %v1022_v1  ;;  %vm285_vm2 = vcmask 1040384  }
  0x58   : > { %v208_v7 = vld [vmem:[#allocation5 + $0x8] sm:$0xff]  ;;  %v211_v10 = vld [vmem:[#allocation5 + $0x18] sm:$0xff]  ;;  %v615_v13 = vld [vmem:[%s1181_s2] ss:$0 sm:$0xff]  ;;  %v373_v20 = vmul.f32 -0.08712328, %v1022_v1 }
  0x59   : > { %v383_v21 = vmul.f32 -0.10255982, %v1022_v1  ;;  %v255_v23 = vmul.f32 -0.09063372, %v1024_v2  ;;  %v265_v24 = vmul.f32 -0.08712328, %v1024_v2 }
  0x5a   : > { %v275_v25 = vmul.f32 -0.10255982, %v1024_v2  ;;  %v364_v26 = vmul.f32 -0.09063372, %v1028_v3  ;;  %v374_v27 = vmul.f32 -0.08712328, %v1028_v3 }
  0x5b   : > { %343 = vrot.lane.b32.xlu1 %v1028_v3, %s838_s20  ;;  %221 = vrot.lane.b32.xlu0 %v1030_v4, %s838_s20  ;;  %v384_v28 = vmul.f32 -0.10255982, %v1028_v3  ;;  %v256_v30 = vmul.f32 -0.09063372, %v1030_v4  ;;  %v266_v31 = vmul.f32 -0.08712328, %v1030_v4 }
  0x5c   : > { %v276_v32 = vmul.f32 -0.10255982, %v1030_v4  ;;  %v450_v38 = vmul.f32 -0.09063372, %v1034_v5  ;;  %v460_v44 = vmul.f32 -0.08712328, %v1034_v5 }
  0x5d   : > { %v470_v45 = vmul.f32 -0.10255982, %v1034_v5  ;;  %v449_v46 = vmul.f32 -0.09063372, %v1036_v6  ;;  %v459_v48 = vmul.f32 -0.08712328, %v1036_v6 }
  0x5e   : > { %v1077_v49 = vmul.f32 -0.10255982, %v1036_v6  ;;  %v616_v60 = vld [vmem:[%s1181_s2 + $0x1] ss:$0 sm:$0xff]  ;;  %vm308_vm3 = vcmask 1046528   ;;  %s634_s5 = smul.u32 768, %s884_s16 }
  0x5f   : > { %429 = vrot.lane.b32.xlu1 %v1034_v5, %s838_s20  ;;  %427 = vrot.lane.b32.xlu0 %v1036_v6, %s838_s20  ;;  %vm333_vm4 = vcmask 130048   ;;  %s204_s11 = scalar_lea.vmem [#allocation7], %s636_s7  ;;  %s509_s28 = scalar_lea.sflag [#allocation4], %s1008_s6 }
  0x60   : > { %s523_s27 = sshll.u32 %s204_s11, 4  ;;  %s1127_s16 = scalar_lea.hbm %s1182_s3, %s634_s5  ;;  %s1129_s27 = int_to_ptr.vmem [resolvable:$true] %s523_s27 }
  0x61   : > { %s761_s26 = scalar_lea.vmem %s1129_s27, 768  ;;  %s840_s30 = smov [#allocation7]  }
  0x62   : > { %p762_p4 = scmp.ne.s32.totalorder %s1129_s27, %s761_s26  ;;  %s765_s7 = sshll.u32 %s840_s30, 4  ;;  %s766_s7 = int_to_ptr.vmem [resolvable:$false] %s765_s7 }
  0x63   : > { %238 = vrot.lane.b32.xlu1 %v1030_v4, %s839_s18  ;;  %236 = vrot.lane.b32.xlu0 %v1024_v2, %s839_s18  ;;  %s767_s10 = scalar_lea.vmem %s766_s7, 1536  ;;  %p768_p10 = scmp.lt.s32.totalorder %s1129_s27, %s766_s7 }
  0x64   : > { %p763_p6 = pnand %p762_p4, %p957_p12  ;;  %p769_p11 = scmp.lt.s32.totalorder %s767_s10, %s761_s26 }
  0x66   : > { %p764_p8 = pneg %p763_p6  ;;  %p770_p3 = por %p769_p11, %p768_p10 }
  0x67   : > { %353 = vrot.lane.b32.xlu1 %v1028_v3, %s839_s18  ;;  %351 = vrot.lane.b32.xlu0 %v1022_v1, %s839_s18 }
  0x68   : > { %p771_p7 = pnand %p770_p3, %p764_p8 }
  0x6b   : > { %439 = vrot.lane.b32.xlu1 %v1034_v5, %s839_s18  ;;  %437 = vrot.lane.b32.xlu0 %v1036_v6, %s839_s18 }
  0x6f   : > { %299 = vperm.xlu1 %702, %v208_v7   ;;  %294 = vperm.xlu0 %701, %v207_v8  }
  0x73   : > { %317 = vperm.xlu1 %702, %v210_v9   ;;  %322 = vperm.xlu0 %701, %v211_v10  }
  0xc9   : > { %v342_v11 = vpop.permute.xlu1 %341  ;;  %v220_v12 = vpop.permute.xlu0 %219 }
  0xca   : > { %v347_v14 = vsel %vm225_vm0, %v1022_v1, %v342_v11  ;;  %v226_v15 = vsel %vm225_vm0, %v1024_v2, %v220_v12 }
  0xcb   : > { %v349_v19 = vmul.f32 %v615_v13, %v347_v14  ;;  %v234_v22 = vmul.f32 %v615_v13, %v226_v15 }
  0xcd   : > { %v344_v17 = vpop.permute.xlu1 %343  ;;  %v222_v18 = vpop.permute.xlu0 %221  ;;  %v361_v36 = vmul.f32 0.100401424, %v349_v19  ;;  %v371_v37 = vmul.f32 -0.117136694, %v349_v19  ;;  %v381_v39 = vmul.f32 0.07239299, %v349_v19 }
  0xce   : > { %v348_v29 = vsel %vm225_vm0, %v1028_v3, %v344_v17  ;;  %v227_v33 = vsel %vm225_vm0, %v1030_v4, %v222_v18  ;;  %v253_v40 = vmul.f32 0.100401424, %v234_v22  ;;  %v263_v47 = vmul.f32 -0.117136694, %v234_v22 }
  0xcf   : > { %v350_v41 = vmul.f32 %v615_v13, %v348_v29  ;;  %v235_v43 = vmul.f32 %v615_v13, %v227_v33  ;;  %v1079_v52 = vadd.f32 %v363_v16, %v361_v36  ;;  %v273_v53 = vmul.f32 0.07239299, %v234_v22 }
  0xd0   : > { %v1083_v56 = vadd.f32 %v373_v20, %v371_v37  ;;  %v1085_v57 = vadd.f32 %v383_v21, %v381_v39  ;;  %v257_v58 = vadd.f32 %v255_v23, %v253_v40  ;;  %v1094_v14 = vadd.f32 %v265_v24, %v263_v47 }
  0xd1   : > { %v430_v34 = vpop.permute.xlu1 %429  ;;  %v428_v35 = vpop.permute.xlu0 %427  ;;  %v362_v59 = vmul.f32 0.100401424, %v350_v41  ;;  %v372_v61 = vmul.f32 -0.117136694, %v350_v41  ;;  %v382_v62 = vmul.f32 0.07239299, %v350_v41  ;;  %v277_v15 = vadd.f32 %v275_v25, %v273_v53 }
  0xd2   : > { %v434_v42 = vsel %vm225_vm0, %v1034_v5, %v430_v34  ;;  %v433_v55 = vsel %vm225_vm0, %v1036_v6, %v428_v35  ;;  %v254_v63 = vmul.f32 0.100401424, %v235_v43  ;;  %v264_v7 = vmul.f32 -0.117136694, %v235_v43 }
  0xd3   : > { %v436_v54 = vmul.f32 %v615_v13, %v434_v42  ;;  %v274_v8 = vmul.f32 0.07239299, %v235_v43  ;;  %v435_v9 = vmul.f32 %v615_v13, %v433_v55  ;;  %v366_v21 = vadd.f32 %v364_v26, %v362_v59 }
  0xd4   : > { %v376_v13 = vadd.f32 %v374_v27, %v372_v61  ;;  %v386_v22 = vadd.f32 %v384_v28, %v382_v62  ;;  %v268_v29 = vadd.f32 %v266_v31, %v264_v7 }
  0xd5   : > { %v239_v50 = vpop.permute.xlu1 %238  ;;  %v237_v51 = vpop.permute.xlu0 %236  ;;  %v448_v16 = vmul.f32 0.100401424, %v436_v54  ;;  %v458_v17 = vmul.f32 -0.117136694, %v436_v54  ;;  %v468_v23 = vmul.f32 0.07239299, %v436_v54  ;;  %v278_v33 = vadd.f32 %v276_v32, %v274_v8 }
  0xd6   : > { %v244_v0 = vsel %vm242_vm1, %v239_v50, %v1030_v4  ;;  %v243_v10 = vsel %vm242_vm1, %v237_v51, %v1024_v2  ;;  %v258_v2 = vadd.f32 %v256_v30, %v254_v63  ;;  %v447_v24 = vmul.f32 0.100401424, %v435_v9 }
  0xd7   : > { %v252_v18 = vmul.f32 %v616_v60, %v244_v0  ;;  %v251_v19 = vmul.f32 %v616_v60, %v243_v10  ;;  %v457_v35 = vmul.f32 -0.117136694, %v435_v9  ;;  %v462_v40 = vadd.f32 %v460_v44, %v458_v17 }
  0xd8   : > { %v472_v26 = vadd.f32 %v470_v45, %v468_v23  ;;  %v467_v27 = vmul.f32 0.07239299, %v435_v9  ;;  %v451_v31 = vadd.f32 %v449_v46, %v447_v24 }
  0xd9   : > { %v354_v11 = vpop.permute.xlu1 %353  ;;  %v352_v12 = vpop.permute.xlu0 %351  ;;  %v260_v41 = vmul.f32 -0.074817225, %v252_v18  ;;  %v270_v32 = vmul.f32 0.058883812, %v252_v18  ;;  %v280_v42 = vmul.f32 0.1661628, %v252_v18  ;;  %v461_v47 = vadd.f32 %v459_v48, %v457_v35 }
  0xda   : > { %v358_v20 = vsel %vm242_vm1, %v354_v11, %v1028_v3  ;;  %v357_v4 = vsel %vm242_vm1, %v352_v12, %v1022_v1  ;;  %v452_v3 = vadd.f32 %v450_v38, %v448_v16  ;;  %v259_v1 = vmul.f32 -0.074817225, %v251_v19 }
  0xdb   : > { %v360_v36 = vmul.f32 %v616_v60, %v358_v20  ;;  %v359_v37 = vmul.f32 %v616_v60, %v357_v4  ;;  %v279_v44 = vmul.f32 0.1661628, %v251_v19  ;;  %v471_v45 = vadd.f32 %v1077_v49, %v467_v27 }
  0xdc   : > { %v261_v38 = vadd.f32 %v259_v1, %v257_v58  ;;  %v269_v55 = vmul.f32 0.058883812, %v251_v19  ;;  %v272_v63 = vadd.f32 %v270_v32, %v268_v29  ;;  %v282_v10 = vadd.f32 %v280_v42, %v278_v33 }
  0xdd   : > { %v440_v34 = vpop.permute.xlu1 %439  ;;  %v438_v25 = vpop.permute.xlu0 %437  ;;  %v368_v50 = vmul.f32 -0.074817225, %v360_v36  ;;  %v367_v51 = vmul.f32 -0.074817225, %v359_v37  ;;  %v378_v59 = vmul.f32 0.058883812, %v360_v36  ;;  %v281_v58 = vadd.f32 %v279_v44, %v277_v15 }
  0xde   : > { %v444_v39 = vsel %vm242_vm1, %v440_v34, %v1034_v5  ;;  %v443_v30 = vsel %vm242_vm1, %v438_v25, %v1036_v6  ;;  %v262_v5 = vadd.f32 %v260_v41, %v258_v2  ;;  %v388_v61 = vmul.f32 0.1661628, %v360_v36 }
  0xdf   : > { %v446_v28 = vmul.f32 %v616_v60, %v444_v39  ;;  %v445_v43 = vmul.f32 %v616_v60, %v443_v30  ;;  %v387_v6 = vmul.f32 0.1661628, %v359_v37  ;;  %v370_v0 = vadd.f32 %v368_v50, %v366_v21 }
  0xe0   : > { %v369_v48 = vadd.f32 %v367_v51, %v1079_v52  ;;  %v286_v8 = vrot.slane %v261_v38, 7  ;;  %v287_v9 = vrot.slane %v262_v5, 7  ;;  %v377_v11 = vmul.f32 0.058883812, %v359_v37 }
  0xe1   : > { %v454_v53 = vmul.f32 -0.074817225, %v446_v28  ;;  %v453_v54 = vmul.f32 -0.074817225, %v445_v43  ;;  %v474_v62 = vmul.f32 0.1661628, %v446_v28  ;;  %v380_v16 = vadd.f32 %v378_v59, %v376_v13 }
  0xe2   : > { %v473_v46 = vmul.f32 0.1661628, %v445_v43  ;;  %v464_v12 = vmul.f32 0.058883812, %v446_v28  ;;  %v463_v49 = vmul.f32 0.058883812, %v445_v43  ;;  %v389_v17 = vadd.f32 %v387_v6, %v1085_v57 }
  0xe3   : > { %v456_v60 = vadd.f32 %v454_v53, %v452_v3  ;;  %v455_v7 = vadd.f32 %v453_v54, %v451_v31  ;;  %v390_v18 = vadd.f32 %v388_v61, %v386_v22  ;;  %v476_v20 = vadd.f32 %v474_v62, %v472_v26 }
  0xe4   : > { %v475_v19 = vadd.f32 %v473_v46, %v471_v45  ;;  %v393_v4 = vrot.slane %v369_v48, 7  ;;  %v394_v23 = vrot.slane %v370_v0, 7  ;;  %v288_v52 = vsel %vm285_vm2, %v286_v8, %v287_v9 }
  0xe5   : > { %v479_v21 = vrot.slane %v455_v7, 7  ;;  %v480_v2 = vrot.slane %v456_v60, 7  ;;  %v271_v29 = vadd.f32 %v269_v55, %v1094_v14  ;;  %v309_v24 = vrot.slane %v281_v58, 1 }
  0xe6   : > { %v310_v15 = vrot.slane %v282_v10, 1  ;;  %v466_v33 = vadd.f32 %v464_v12, %v462_v40  ;;  %v291_v34 = vsel %vm285_vm2, %v261_v38, %v286_v8  ;;  %v379_v13 = vadd.f32 %v377_v11, %v1083_v56 }
  0xe7   : > { %v465_v25 = vadd.f32 %v463_v49, %v461_v47  ;;  %v405_v57 = vrot.slane %v389_v17, 1  ;;  %v406_v22 = vrot.slane %v390_v18, 1  ;;  %v491_v35 = vrot.slane %v475_v19, 1 }
  0xe8   : > { %v492_v36 = vrot.slane %v476_v20, 1  ;;  %v395_v37 = vsel %vm285_vm2, %v393_v4, %v394_v23  ;;  %v481_v39 = vsel %vm285_vm2, %v479_v21, %v480_v2  ;;  %v398_v41 = vsel %vm285_vm2, %v369_v48, %v393_v4 }
  0xe9   : > { %v484_v14 = vsel %vm285_vm2, %v455_v7, %v479_v21  ;;  %v311_v27 = vsel %vm308_vm3, %v309_v24, %v310_v15  ;;  %v314_v56 = vsel %vm308_vm3, %v310_v15, %v282_v10  ;;  %v407_v42 = vsel %vm308_vm3, %v405_v57, %v406_v22 }
  0xea   : > { %v493_v43 = vsel %vm308_vm3, %v491_v35, %v492_v36  ;;  %v410_v47 = vsel %vm308_vm3, %v406_v22, %v390_v18  ;;  %v496_v50 = vsel %vm308_vm3, %v492_v36, %v476_v20 }
  0xee   : > { %v300_v3 = vpop.permute.xlu1 %299  ;;  %v295_v1 = vpop.permute.xlu0 %294 }
  0xef   : > { %v303_v40 = vmul.f32 %v300_v3, %v288_v52  ;;  %v302_v26 = vmul.f32 %v295_v1, %v291_v34  ;;  %v400_v28 = vmul.f32 %v395_v37, %v300_v3  ;;  %v486_v30 = vmul.f32 %v481_v39, %v300_v3 }
  0xf0   : > { %v399_v31 = vmul.f32 %v398_v41, %v295_v1  ;;  %v485_v32 = vmul.f32 %v484_v14, %v295_v1 }
  0xf1   : > { %v305_v51 = vadd.f32 %v303_v40, %v272_v63  ;;  %v304_v53 = vadd.f32 %v302_v26, %v271_v29  ;;  %v402_v6 = vadd.f32 %v400_v28, %v380_v16  ;;  %v488_v62 = vadd.f32 %v486_v30, %v466_v33 }
  0xf2   : > { %v401_v5 = vadd.f32 %v399_v31, %v379_v13  ;;  %v487_v38 = vadd.f32 %v485_v32, %v465_v25  ;;  %v318_v44 = vpop.permute.xlu1 %317  ;;  %v323_v54 = vpop.permute.xlu0 %322 }
  0xf3   : > { %v325_v45 = vmul.f32 %v318_v44, %v311_v27  ;;  %v411_v55 = vmul.f32 %v407_v42, %v318_v44  ;;  %v497_v59 = vmul.f32 %v493_v43, %v318_v44  ;;  %v326_v61 = vmul.f32 %v323_v54, %v314_v56 }
  0xf4   : > { %v412_v46 = vmul.f32 %v410_v47, %v323_v54  ;;  %v498_v0 = vmul.f32 %v496_v50, %v323_v54 }
  0xf5   : > { %v327_v48 = vadd.f32 %v325_v45, %v304_v53  ;;  %v413_v60 = vadd.f32 %v411_v55, %v401_v5  ;;  %v499_v7 = vadd.f32 %v497_v59, %v487_v38  ;;  %v328_v8 = vadd.f32 %v326_v61, %v305_v51 }
  0xf6   : > { %v414_v63 = vadd.f32 %v412_v46, %v402_v6  ;;  %v500_v9 = vadd.f32 %v498_v0, %v488_v62 }
  0xf7   : > { %v329_v58 = vadd.f32 -0.24424557, %v327_v48  ;;  %v415_v10 = vadd.f32 -0.24424557, %v413_v60  ;;  %v501_v11 = vadd.f32 -0.24424557, %v499_v7 }
  0xf8   : > { %v330_v12 = vadd.f32 -0.24424557, %v328_v8  ;;  %v416_v49 = vadd.f32 -0.24424557, %v414_v63  ;;  %v502_v16 = vadd.f32 -0.24424557, %v500_v9 }
  0xf9   : > { %v331_v17 = vmax.f32 %v329_v58, 0.0  ;;  %v417_v18 = vmax.f32 %v415_v10, 0.0  ;;  %v503_v19 = vmax.f32 %v501_v11, 0.0 }
  0xfa   : > { %v332_v20 = vmax.f32 %v330_v12, 0.0  ;;  %v418_v4 = vmax.f32 %v416_v49, 0.0  ;;  %v504_v23 = vmax.f32 %v502_v16, 0.0 }
  0xfb   : > { %334 = vst.msk [vmem:[%s204_s11] sm:$0xff] %vm333_vm4, %v331_v17  ;;  %619 = vst.msk [vmem:[%s204_s11 + $0x10] sm:$0xff] %vm333_vm4, %v417_v18 }
  0xfc   : > { %623 = vst.msk [vmem:[%s204_s11 + $0x20] sm:$0xff] %vm333_vm4, %v503_v19  ;;  %335 = vst.msk [vmem:[%s204_s11 + $0x8] sm:$0xff] %vm333_vm4, %v332_v20 }
  0xfd   : > { %620 = vst.msk [vmem:[%s204_s11 + $0x18] sm:$0xff] %vm333_vm4, %v418_v4  ;;  %624 = vst.msk [vmem:[%s204_s11 + $0x28] sm:$0xff] %vm333_vm4, %v504_v23 }
  0xfe   : > { %774 = shalt.err (!%p771_p7)
}
  0xff   : > { %s775_s29 = scalar_lea.hbm %s1127_s16, 768  ;;  %s779_s8 = scalar_lea.hbm %s1182_s3, 1536 }
 0x100   : > { %p776_p9 = scmp.ne.s32.totalorder %s1127_s16, %s775_s29  ;;  %p780_p5 = scmp.lt.u32.totalorder %s1127_s16, %s1182_s3 }
 0x101   : > { %p781_p13 = scmp.lt.u32.totalorder %s779_s8, %s775_s29  ;;  %p783_p4 = scmp.lt.u32.totalorder %s775_s29, %s1127_s16 }
 0x102   : > { %p777_p1 = pnand %p776_p9, %p957_p12 }
 0x103   : > { %p782_p2 = por %p781_p13, %p780_p5 }
 0x104   : > { %p778_p0 = pneg %p777_p1 }
 0x105   : > { %p784_p6 = por %p783_p4, %p782_p2 }
 0x107   : > { %p785_p8 = pnand %p784_p6, %p778_p0 }
 0x109   : > { %788 = shalt.err (!%p785_p8)
}
 0x10a   : > { %s841_s4 = smov 128   ;;  %s842_s5 = smov 8  }
 0x10b   : > { %643 = dma.vmem_to_hbm [thread:$0]  (%p957_p12), %s1129_s27, 768, %s1127_s16, %s509_s28, %s841_s4, %s841_s4, %s842_s5  }
 0x10c PF: > { %s538_s11 = sand.u32 1, %s819_s12   ;;  %p1197_p10 = scmp.ne.s32.totalorder %s1187_s19, 0 }
 0x10d   : > { %p1198_p11 = scmp.ge.s32.totalorder %s831_s15, 2  ;;  %s539_s22 = scalar_lea.sflag [#allocation4], %s538_s11 }
 0x10f   : > { %p654_p3 = pnand %p1198_p11, %p1197_p10 }
 0x111   : > { %814 = dma.done.wait (!%p654_p3), %s539_s22, 768  }
 0x112   : > { %816 = vsyncadd (!%p654_p3), %s539_s22, 4294966528  ;;  %p17_p7 = scmp.ge.s32.totalorder %s919_s24, 4   ;;  %s1199_s12 = smov %s823_s13 }
 0x113   : > { %s1200_s13 = smov %s827_s14  ;;  %s1201_s14 = smov %s953_s17 }
 0x114   : > { %s1202_s15 = smov %s919_s24  ;;  %19 = sbr.rel (!%p17_p7) target bundleno = 6 (0x6), region = 87 }
 0x11b   :  { %544 = vsyncpa [#allocation3], 1 }
 0x11c   :  { %546 = vsyncpa [#allocation3 + $0x1], 1 }
 0x11d   :  { %547 = vsyncpa [#allocation6], 1 }
 0x11e   :  { %548 = vsyncpa [#allocation4], 1 }
 0x11f   :  { %550 = vsyncpa [#allocation4 + $0x1], 1 }

</bundles_post_ra>
